<compile_context>
chip_gen: v6e
topology: v6e:2x2x1
jax: 0.10.0
libtpu: 0.0.40
codegen_flags: <defaults>
</compile_context>

<pallas_src>
import functools

import jax
import jax.numpy as jnp
from jax.experimental import pallas as pl
from jax.experimental.pallas import tpu as pltpu

_LANE = 128


def _silu_kernel(x_ref, o_ref):
    # Upcast to f32 for a numerically stable, dtype-agnostic path.
    x = x_ref[...].astype(jnp.float32)
    # sigmoid(x) = 0.5 * (tanh(x/2) + 1): one EUP transcendental, VPU stays free.
    sig = 0.5 * (jnp.tanh(0.5 * x) + 1.0)
    o_ref[...] = (x * sig).astype(o_ref.dtype)


@functools.lru_cache(maxsize=1)
def _tpu_hw():
    """Per-generation tuning: (block_bytes, vmem_limit_bytes, multi_core)."""
    try:
        vmem_phys = int(getattr(pltpu.get_tpu_info(), "vmem_capacity_bytes", 0))
    except Exception:  # unknown backend / interpret mode -> conservative defaults
        vmem_phys = 0
    if vmem_phys >= (96 << 20):
        # v5e / v6e class: 128 MiB physical VMEM, single TensorCore.
        return (8 << 20), (64 << 20), False
    if vmem_phys > 0:
        # v7x class: 64 MiB physical VMEM per TC (32 MiB scoped default), 2 TCs.
        # Keep double-buffered in+out (16 MiB) well inside the scoped limit.
        return (4 << 20), (32 << 20), True
    # Unknown hardware: settings that are safe on every generation.
    return (4 << 20), (32 << 20), False


def _silu_pallas_2d(x2d, *, target_block_bytes=None, donate_input=False):
    """SiLU over a (rows, width) slab whose width is a multiple of 128."""
    rows, width = x2d.shape
    dtype = x2d.dtype
    itemsize = jnp.dtype(dtype).itemsize
    # Sublane packing: 8 (f32), 16 (bf16/f16), 32 (int8/fp8).
    sublanes = max(8, 32 // itemsize)

    hw_block_bytes, vmem_limit, multi_core = _tpu_hw()
    block_bytes = target_block_bytes or hw_block_bytes

    bytes_per_row = width * itemsize
    max_rows_per_block = max(1, block_bytes // bytes_per_row)
    if rows <= max_rows_per_block:
        if multi_core and rows >= 2 * sublanes:
            # Two TensorCores (v7x): give the "parallel" grid axis >=2 steps
            # so both cores take a share of the work.
            tr = pl.cdiv(pl.cdiv(rows, 2), sublanes) * sublanes
        else:
            # Single TC (v5e/v6e) or tiny slab: one full-extent block; a
            # forced split would only add a wasted pipeline step.
            tr = rows
    else:
        tr = max(sublanes, (max_rows_per_block // sublanes) * sublanes)
    grid_steps = pl.cdiv(rows, tr)

    extra = {}
    if donate_input:
        # Output reuses the input HBM buffer (caller promises x is dead).
        extra["input_output_aliases"] = {0: 0}

    return pl.pallas_call(
        _silu_kernel,
        out_shape=jax.ShapeDtypeStruct((rows, width), dtype),
        grid_spec=pltpu.PrefetchScalarGridSpec(
            num_scalar_prefetch=0,
            grid=(grid_steps,),
            in_specs=[pl.BlockSpec((tr, width), lambda i: (i, 0))],
            out_specs=pl.BlockSpec((tr, width), lambda i: (i, 0)),
        ),
        compiler_params=pltpu.CompilerParams(
            dimension_semantics=("parallel",),
            vmem_limit_bytes=vmem_limit,
        ),
        **extra,
    )(x2d)


def silu(x: jax.Array, *, target_block_bytes=None, donate_input=False) -> jax.Array:
    """Elementwise SiLU (x * sigmoid(x)) via a Pallas TPU kernel. Any shape."""
    orig_shape = x.shape
    dtype = x.dtype
    total = x.size
    if total == 0:
        return x

    x_flat = jnp.reshape(x, (-1,))

    # Widest lane width (multiple of 128) dividing the element count: no
    # wrapper-side pad/slice copies for typical aligned activation shapes.
    width = None
    for w in (1024, 512, 256, 128):
        if total % w == 0:
            width = w
            break

    if width is not None:
        out2d = _silu_pallas_2d(
            jnp.reshape(x_flat, (total // width, width)),
            target_block_bytes=target_block_bytes,
            donate_input=donate_input,
        )
        return jnp.reshape(out2d, orig_shape)

    # Ragged element count: kernel over the 128-aligned prefix, <128-element
    # tail in plain jnp.  Replaces the old pad+slice path, which cost two
    # extra full HBM round trips on a bandwidth-bound op.
    aligned = (total // _LANE) * _LANE
    if aligned == 0:
        xf = x_flat.astype(jnp.float32)
        return jnp.reshape((xf * jax.nn.sigmoid(xf)).astype(dtype), orig_shape)
    head = _silu_pallas_2d(
        jnp.reshape(x_flat[:aligned], (aligned // _LANE, _LANE)),
        target_block_bytes=target_block_bytes,
        donate_input=False,
    )
    tail_x = x_flat[aligned:].astype(jnp.float32)
    tail = (tail_x * jax.nn.sigmoid(tail_x)).astype(dtype)
    out_flat = jnp.concatenate([jnp.reshape(head, (-1,)), tail])
    return jnp.reshape(out_flat, orig_shape)


if __name__ == "__main__":
    # NCHW input, consistent with PyTorch conv-style activations.
    key = jax.random.PRNGKey(0)
    x = jax.random.normal(key, (2, 4, 16, 16), dtype=jnp.float32)

    y = jax.block_until_ready(silu(x))
    y_ref = x * jax.nn.sigmoid(x)
    assert y.shape == x.shape and y.dtype == x.dtype
    assert jnp.max(jnp.abs(y - y_ref)) < 1e-5

    # Ragged, < 128 elements: pure-jnp tail-only path.
    x2 = jax.random.normal(jax.random.PRNGKey(1), (3, 5, 7), dtype=jnp.float32)
    y2 = jax.block_until_ready(silu(x2))
    assert jnp.max(jnp.abs(y2 - x2 * jax.nn.sigmoid(x2))) < 1e-5

    # Ragged, > 128 elements: 128-aligned prefix through the kernel + jnp tail.
    x4 = jax.random.normal(jax.random.PRNGKey(3), (3, 7, 19), dtype=jnp.float32)
    y4 = jax.block_until_ready(silu(x4))
    assert y4.shape == x4.shape
    assert jnp.max(jnp.abs(y4 - x4 * jax.nn.sigmoid(x4))) < 1e-5

    # bf16 activations: dtype-aware sublane packing, f32 internal compute.
    x3 = jax.random.normal(jax.random.PRNGKey(2), (2, 8, 32, 32), dtype=jnp.bfloat16)
    y3 = jax.block_until_ready(silu(x3))
    x3f = x3.astype(jnp.float32)
    ref3 = (x3f * jax.nn.sigmoid(x3f)).astype(jnp.bfloat16).astype(jnp.float32)
    assert y3.dtype == jnp.bfloat16
    assert jnp.max(jnp.abs(y3.astype(jnp.float32) - ref3)) < 2e-2

    print("KERNEL_OK")
</pallas_src>

<mosaic_0001>
module attributes {stable_mosaic.version = 11 : i64} {
  func.func @_silu_kernel(%arg0: i32, %arg1: memref<2x1024xf32, #tpu.memory_space<vmem>>, %arg2: memref<2x1024xf32, #tpu.memory_space<vmem>>) attributes {dimension_semantics = [#tpu.dimension_semantics<parallel>], iteration_bounds = array<i64: 1>, scalar_prefetch = 0 : i64, scratch_operands = 0 : i64, tpu.core_type = #tpu.core_type<tc>, window_params = [{transform_indices = @transform_0, window_bounds = array<i64: 2, 1024>}, {transform_indices = @transform_1, window_bounds = array<i64: 2, 1024>}]} {
    %c0 = arith.constant 0 : index
    %c0_0 = arith.constant 0 : index
    %0 = vector.load %arg1[%c0, %c0_0] : memref<2x1024xf32, #tpu.memory_space<vmem>>, vector<2x1024xf32>
    %cst = arith.constant 5.000000e-01 : f32
    %1 = vector.broadcast %cst : f32 to vector<2x1024xf32>
    %2 = arith.mulf %1, %0 : vector<2x1024xf32>
    %3 = math.tanh %2 : vector<2x1024xf32>
    %cst_1 = arith.constant 1.000000e+00 : f32
    %4 = vector.broadcast %cst_1 : f32 to vector<2x1024xf32>
    %5 = arith.addf %3, %4 : vector<2x1024xf32>
    %cst_2 = arith.constant 5.000000e-01 : f32
    %6 = vector.broadcast %cst_2 : f32 to vector<2x1024xf32>
    %7 = arith.mulf %6, %5 : vector<2x1024xf32>
    %8 = arith.mulf %0, %7 : vector<2x1024xf32>
    %c0_3 = arith.constant 0 : index
    %c0_4 = arith.constant 0 : index
    %9 = vector.load %arg2[%c0_3, %c0_4] : memref<2x1024xf32, #tpu.memory_space<vmem>>, vector<2x1024xf32>
    tpu.vector_store %arg2[%c0_3, %c0_4], %8 {strides = array<i32>} : memref<2x1024xf32, #tpu.memory_space<vmem>>, vector<2x1024xf32>,
    return
  }
  func.func @transform_0(%arg0: i32) -> (i32, i32) {
    %c0_i32 = arith.constant 0 : i32
    %c0_i32_0 = arith.constant 0 : i32
    return %arg0, %c0_i32 : i32, i32
  }
  func.func @transform_1(%arg0: i32) -> (i32, i32) {
    %c0_i32 = arith.constant 0 : i32
    %c0_i32_0 = arith.constant 0 : i32
    return %arg0, %c0_i32 : i32, i32
  }
}

</mosaic_0001>

<bundles_post_ra>
// kernel: tpu_custom_call.1
= control target key start
LH: loop header
LB: loop body
LE: loop exit
PB: predicated region body
PF: predicated region fallthrough
CT: control target
= control target key end

     0   :  { %6 = vsyncpa [#allocation3], 0  ;;  %s118_s0 = inlined_call_operand.hbm [shape: f32[2,1024], index: 0, kind: input, shape index: {}]   ;;  %s119_s1 = inlined_call_operand.hbm [shape: f32[2,1024], index: 1, kind: output, shape index: {}]  }
   0x1   :  { %7 = vsyncpa [#allocation4], 0  ;;  %s100_s6 = smov [#allocation2]  }
   0x2   :  { %s14_s7 = sshll.u32 %s100_s6, 4  ;;  %s15_s7 = int_to_ptr.vmem [resolvable:$true] %s14_s7 }
   0x3   :  { %s64_s8 = scalar_lea.vmem %s15_s7, 256  ;;  %p69_p1 = scmp.lt.s32.totalorder %s15_s7, %s15_s7 }
   0x4   :  { %p65_p0 = scmp.ne.s32.totalorder %s15_s7, %s64_s8  ;;  %p70_p2 = scmp.lt.s32.totalorder %s64_s8, %s64_s8 }
   0x6   :  { %p71_p3 = por %p70_p2, %p69_p1 }
   0x8   :  { %p72_p4 = pnand %p71_p3, %p65_p0 }
   0xa   :  { %75 = shalt.err (!%p72_p4)
}
   0xb   :  { %17 = dma.hbm_to_vmem [thread:$0]  %s118_s0, 256, %s15_s7, [#allocation3]  }
   0xc   :  { %96 = dma.done.wait [#allocation3], 256  }
   0xd   :  { %97 = vsyncadd [#allocation3], 4294967040  ;;  %v21_v0 = vld [vmem:[#allocation2] sm:$0xff]  ;;  %v22_v1 = vld [vmem:[#allocation2 + $0x8] sm:$0xff]  ;;  %s101_s11 = smov [#allocation5]  }
   0xe   :  { %v23_v2 = vmul.f32 0.5, %v21_v0  ;;  %v24_v3 = vmul.f32 0.5, %v22_v1  ;;  %s41_s12 = sshll.u32 %s101_s11, 4  ;;  %s42_s12 = int_to_ptr.vmem [resolvable:$true] %s41_s12 }
   0xf   :  { %s76_s0 = scalar_lea.vmem %s42_s12, 256  ;;  %p81_p6 = scmp.lt.s32.totalorder %s42_s12, %s42_s12 }
  0x10   :  { %52 = vtanh.f32 %v23_v2  ;;  %p77_p5 = scmp.ne.s32.totalorder %s42_s12, %s76_s0  ;;  %p82_p7 = scmp.lt.s32.totalorder %s76_s0, %s76_s0 }
  0x11   :  { %54 = vtanh.f32 %v24_v3 }
  0x12   :  { %p83_p8 = por %p82_p7, %p81_p6 }
  0x14   :  { %p84_p9 = pnand %p83_p8, %p77_p5 }
  0x1d   :  { %v53_v4 = vpop.eup %52 }
  0x1e   :  { %v55_v5 = vpop.eup %54  ;;  %v27_v6 = vadd.f32 1.0, %v53_v4 }
  0x1f   :  { %v28_v7 = vadd.f32 1.0, %v55_v5 }
  0x20   :  { %v29_v8 = vmul.f32 0.5, %v27_v6 }
  0x21   :  { %v30_v9 = vmul.f32 0.5, %v28_v7 }
  0x22   :  { %v31_v10 = vmul.f32 %v29_v8, %v21_v0 }
  0x23   :  { %v32_v11 = vmul.f32 %v30_v9, %v22_v1 }
  0x24   :  { %33 = vst [vmem:[#allocation5] sm:$0xff] %v31_v10 }
  0x25   :  { %34 = vst [vmem:[#allocation5 + $0x8] sm:$0xff] %v32_v11 }
  0x26   :  { %87 = shalt.err (!%p84_p9)
}
  0x27   :  { %44 = dma.vmem_to_hbm [thread:$0]  %s42_s12, 256, %s119_s1, [#allocation4]  }
  0x28   :  { %98 = dma.done.wait [#allocation4], 256  }
  0x29   :  { %99 = vsyncadd [#allocation4], 4294967040 }
  0x2a   :  { %48 = vsyncpa [#allocation3], 1 }
  0x2b   :  { %49 = vsyncpa [#allocation4], 1 }

</bundles_post_ra>
